<compile_context>
chip_gen: v5e
topology: v5e:2x2
jax: 0.10.0
libtpu: 0.0.40
codegen_flags: <defaults>
</compile_context>

<pallas_src>
import functools

import jax
import jax.numpy as jnp
from jax.experimental import pallas as pl
from jax.experimental.pallas import tpu as pltpu

_LANES = 128        # lane width: every weight block is 128 lanes wide
_BLOCK_ROWS = 128   # each layer occupies one 128-row block of the packed slab


def _round_up(x, m):
    return ((x + m - 1) // m) * m


def _actor_kernel(n_layers, input_size, out_size, x_ref, w_ref, probs_ref):
    """x_ref: [TB, input_size] f32 state tile.
    w_ref: [n_layers*128, 128] packed zero-padded weight slab (bf16, VMEM-resident,
           constant block index so it is fetched once).
    probs_ref: [TB, out_size] f32 softmax probabilities."""
    f32 = jnp.float32
    mx_dtype = w_ref.dtype                          # bf16 slab -> bf16 MXU operands
    x = x_ref[...].astype(f32)                      # [TB, input_size]

    # ---- layer 0 (hidden): K = input_size is tiny (2 for MountainCar) ----
    # A couple of VPU broadcast-multiply-adds beat a latency-bound MXU round trip.
    if input_size <= 4:
        w0 = w_ref[pl.ds(0, 8), :].astype(f32)      # [8, 128]; rows >= input_size are zero
        acc = x[:, 0:1] * w0[0:1, :]
        for k in range(1, input_size):
            acc = acc + x[:, k:k + 1] * w0[k:k + 1, :]
        h = jnp.tanh(acc)                           # [TB, 128] f32
    else:
        w0 = w_ref[pl.ds(0, _BLOCK_ROWS), :][:input_size, :]
        h = jnp.tanh(jnp.dot(x.astype(mx_dtype), w0, preferred_element_type=f32))

    # ---- middle hidden layers: one 128x128 MXU tile each (zero padding stays 0) ----
    for i in range(1, n_layers - 1):
        w = w_ref[pl.ds(i * _BLOCK_ROWS, _BLOCK_ROWS), :]
        h = jnp.tanh(jnp.dot(h.astype(mx_dtype), w, preferred_element_type=f32))

    # ---- final linear layer + masked softmax over the first out_size lanes (f32) ----
    wl = w_ref[pl.ds((n_layers - 1) * _BLOCK_ROWS, _BLOCK_ROWS), :]
    logits = jnp.dot(h.astype(mx_dtype), wl, preferred_element_type=f32)   # [TB, 128]
    lane = jax.lax.broadcasted_iota(jnp.int32, logits.shape, dimension=1)
    logits = jnp.where(lane < out_size, logits, jnp.float32(-1e30))

    m = jnp.max(logits, axis=-1, keepdims=True)
    e = jnp.exp(logits - m)
    denom = jnp.sum(e, axis=-1, keepdims=True)
    probs = e / denom                               # exact divide: rows sum to 1 (f32)
    probs_ref[...] = probs[:, :out_size].astype(probs_ref.dtype)


def pack_actor_weights(weights, dtype=jnp.bfloat16):
    """Pack per-layer [in_i, out_i] (already W^T) weights into one lane-dense,
    zero-padded slab [n_layers*128, 128].  Do this ONCE and reuse across RL
    steps.  bf16 by default: MXU-native on v6e/v7x (and still fine on the v5e
    MXU), halves the slab's DMA / VMEM footprint; accumulation stays f32."""
    n_layers = len(weights)
    slab = jnp.zeros((n_layers * _BLOCK_ROWS, _LANES), dtype)
    for i, w in enumerate(weights):
        k, m = w.shape
        assert k <= _BLOCK_ROWS and m <= _LANES, "layer dims must be <= 128 for this packing"
        slab = slab.at[i * _BLOCK_ROWS:i * _BLOCK_ROWS + k, :m].set(w.astype(dtype))
    return slab


def actor_forward_packed(state, w_slab, n_layers, input_size, out_size,
                         *, batch_tile=1024):
    """state: [B, input_size] f32; w_slab: packed weights from pack_actor_weights().
    Returns softmax probabilities [B, out_size] f32."""
    assert n_layers >= 2
    B = state.shape[0]
    if B > batch_tile:
        TB = batch_tile
    elif B >= 64:
        # v7x has 2 TensorCores: give the "parallel" batch axis >= 2 programs
        # for mid-size batches so both cores get work.  No effect on v5e/v6e.
        TB = max(8, _round_up((B + 1) // 2, 8))
    else:
        TB = max(8, _round_up(B, 8))
    B_pad = _round_up(B, TB)

    x = state.astype(jnp.float32)
    if B_pad != B:
        x = jnp.pad(x, ((0, B_pad - B), (0, 0)))    # tiny row-only pad (no lane padding)

    kernel = functools.partial(_actor_kernel, n_layers, input_size, out_size)

    probs = pl.pallas_call(
        kernel,
        out_shape=jax.ShapeDtypeStruct((B_pad, out_size), jnp.float32),
        grid=(B_pad // TB,),
        in_specs=[
            # state tile: last dim equals the full array dim -> no 128-lane padding
            pl.BlockSpec((TB, input_size), lambda b: (b, 0)),
            # packed weight slab: constant block index -> fetched once, stays resident
            pl.BlockSpec((n_layers * _BLOCK_ROWS, _LANES), lambda b: (0, 0)),
        ],
        out_specs=pl.BlockSpec((TB, out_size), lambda b: (b, 0)),
        compiler_params=pltpu.CompilerParams(dimension_semantics=("parallel",)),
    )(x, w_slab)

    return probs if B_pad == B else probs[:B]


def actor_forward(state, weights, **kwargs):
    """Convenience wrapper: packs weights each call (prefer the packed path in loops)."""
    return actor_forward_packed(
        state, pack_actor_weights(weights),
        n_layers=len(weights),
        input_size=weights[0].shape[0],
        out_size=weights[-1].shape[1],
        **kwargs)


def init_actor_weights(key, input_size, h_layers_sizes, output_size):
    """Deterministic init mirroring nn.Linear(bias=False) default
    (kaiming-uniform: U(-1/sqrt(fan_in), 1/sqrt(fan_in))).
    Weights are stored as [in, out] (i.e. PyTorch weight transposed)."""
    sizes = [input_size] + list(h_layers_sizes) + [output_size]
    weights = []
    for i in range(len(sizes) - 1):
        key, sub = jax.random.split(key)
        bound = 1.0 / jnp.sqrt(jnp.float32(sizes[i]))
        w = jax.random.uniform(sub, (sizes[i], sizes[i + 1]),
                               minval=-bound, maxval=bound, dtype=jnp.float32)
        weights.append(w)
    return weights


def actor_forward_ref(state, weights):
    """Pure-JAX f32 reference for correctness checking."""
    h = state
    for w in weights[:-1]:
        h = jnp.tanh(h @ w)
    return jax.nn.softmax(h @ weights[-1], axis=-1)


if __name__ == "__main__":
    # MountainCar-v0: observation dim 2, action dim 3; small hidden stack.
    input_size = 2
    h_layers_sizes = [32, 32]
    output_size = 3
    batch = 8

    key = jax.random.PRNGKey(0)
    k_w, k_x = jax.random.split(key)

    weights = init_actor_weights(k_w, input_size, h_layers_sizes, output_size)
    state = jax.random.normal(k_x, (batch, input_size), dtype=jnp.float32)

    # Pack the weights once (bf16, VMEM-resident slab reused across RL steps).
    w_slab = pack_actor_weights(weights)
    fwd = jax.jit(functools.partial(actor_forward_packed,
                                    n_layers=len(weights),
                                    input_size=input_size,
                                    out_size=output_size))

    probs = jax.block_until_ready(fwd(state, w_slab))

    # sanity check against pure-JAX f32 reference
    probs_ref = jax.block_until_ready(actor_forward_ref(state, weights))
    assert probs.shape == (batch, output_size)
    # bf16 matmul operands (f32 accumulate) -> ~1e-3-level deltas vs f32 reference
    assert jnp.allclose(probs, probs_ref, atol=1e-2, rtol=1e-2), "mismatch vs reference"
    # exact divide in-kernel -> each row sums to 1 to f32 precision
    assert jnp.allclose(jnp.sum(probs, axis=-1), 1.0, atol=1e-5), "probs must sum to 1"

    # TODO(synk): Categorical sampling and actor+critic fusion into one launch per
    # env step stay in host/JAX code; the kernel returns the probability vector
    # that defines the distribution.

    print("KERNEL_OK")
</pallas_src>

<mosaic_0001>
module attributes {stable_mosaic.version = 11 : i64} {
  func.func @_actor_kernel(%arg0: i32, %arg1: memref<8x2xf32, #tpu.memory_space<vmem>>, %arg2: memref<384x128xbf16, #tpu.memory_space<vmem>>, %arg3: memref<8x3xf32, #tpu.memory_space<vmem>>) attributes {dimension_semantics = [#tpu.dimension_semantics<parallel>], iteration_bounds = array<i64: 1>, scalar_prefetch = 0 : i64, scratch_operands = 0 : i64, tpu.core_type = #tpu.core_type<tc>, window_params = [{transform_indices = @transform_0, window_bounds = array<i64: 8, 2>}, {pipeline_mode = #tpu.pipeline_mode<synchronous>, transform_indices = @transform_1, window_bounds = array<i64: 384, 128>}, {transform_indices = @transform_2, window_bounds = array<i64: 8, 3>}]} {
    %c0 = arith.constant 0 : index
    %c0_0 = arith.constant 0 : index
    %0 = vector.load %arg1[%c0, %c0_0] : memref<8x2xf32, #tpu.memory_space<vmem>>, vector<8x2xf32>
    %c0_1 = arith.constant 0 : index
    %c0_2 = arith.constant 0 : index
    %1 = vector.load %arg2[%c0_1, %c0_2] : memref<384x128xbf16, #tpu.memory_space<vmem>>, vector<8x128xbf16>
    %2 = arith.extf %1 : vector<8x128xbf16> to vector<8x128xf32>
    %3 = vector.extract_strided_slice %0 {offsets = [0, 0], sizes = [8, 1], strides = [1, 1]} : vector<8x2xf32> to vector<8x1xf32>
    %4 = vector.extract_strided_slice %2 {offsets = [0, 0], sizes = [1, 128], strides = [1, 1]} : vector<8x128xf32> to vector<1x128xf32>
    %5 = vector.broadcast %3 : vector<8x1xf32> to vector<8x128xf32>
    %6 = vector.broadcast %4 : vector<1x128xf32> to vector<8x128xf32>
    %7 = arith.mulf %5, %6 : vector<8x128xf32>
    %8 = vector.extract_strided_slice %0 {offsets = [0, 1], sizes = [8, 1], strides = [1, 1]} : vector<8x2xf32> to vector<8x1xf32>
    %9 = vector.extract_strided_slice %2 {offsets = [1, 0], sizes = [1, 128], strides = [1, 1]} : vector<8x128xf32> to vector<1x128xf32>
    %10 = vector.broadcast %8 : vector<8x1xf32> to vector<8x128xf32>
    %11 = vector.broadcast %9 : vector<1x128xf32> to vector<8x128xf32>
    %12 = arith.mulf %10, %11 : vector<8x128xf32>
    %13 = arith.addf %7, %12 : vector<8x128xf32>
    %14 = math.tanh %13 : vector<8x128xf32>
    %c128 = arith.constant 128 : index
    %c0_3 = arith.constant 0 : index
    %15 = vector.load %arg2[%c128, %c0_3] : memref<384x128xbf16, #tpu.memory_space<vmem>>, vector<128x128xbf16>
    %16 = arith.truncf %14 : vector<8x128xf32> to vector<8x128xbf16>
    %cst = arith.constant dense<0.000000e+00> : vector<8x128xf32>
    %17 = tpu.matmul %16, %15, %cst {dimension_numbers = #tpu.dot_dimension_numbers<[1], [0], [0], [1], [0, 0, 1, 1], [], []>} : vector<8x128xbf16>, vector<128x128xbf16>, vector<8x128xf32> -> vector<8x128xf32>
    %18 = math.tanh %17 : vector<8x128xf32>
    %c256 = arith.constant 256 : index
    %c0_4 = arith.constant 0 : index
    %19 = vector.load %arg2[%c256, %c0_4] : memref<384x128xbf16, #tpu.memory_space<vmem>>, vector<128x128xbf16>
    %20 = arith.truncf %18 : vector<8x128xf32> to vector<8x128xbf16>
    %cst_5 = arith.constant dense<0.000000e+00> : vector<8x128xf32>
    %21 = tpu.matmul %20, %19, %cst_5 {dimension_numbers = #tpu.dot_dimension_numbers<[1], [0], [0], [1], [0, 0, 1, 1], [], []>} : vector<8x128xbf16>, vector<128x128xbf16>, vector<8x128xf32> -> vector<8x128xf32>
    %22 = tpu.iota {dimensions = array<i32: 1>} : vector<8x128xi32>
    %c3_i32 = arith.constant 3 : i32
    %23 = vector.broadcast %c3_i32 : i32 to vector<8x128xi32>
    %24 = arith.cmpi slt, %22, %23 : vector<8x128xi32>
    %cst_6 = arith.constant -1.000000e+30 : f32
    %25 = vector.broadcast %cst_6 : f32 to vector<8x128xf32>
    %26 = arith.select %24, %21, %25 : vector<8x128xi1>, vector<8x128xf32>
    %cst_7 = arith.constant dense<0xFF800000> : vector<8xf32>
    %27 = vector.multi_reduction <maximumf>, %26, %cst_7 [1] : vector<8x128xf32> to vector<8xf32>
    %28 = vector.shape_cast %27 : vector<8xf32> to vector<8x1xf32>
    %29 = vector.broadcast %28 : vector<8x1xf32> to vector<8x128xf32>
    %30 = arith.subf %26, %29 : vector<8x128xf32>
    %31 = math.exp %30 : vector<8x128xf32>
    %cst_8 = arith.constant dense<0.000000e+00> : vector<8xf32>
    %32 = vector.multi_reduction <add>, %31, %cst_8 [1] : vector<8x128xf32> to vector<8xf32>
    %33 = vector.shape_cast %32 : vector<8xf32> to vector<8x1xf32>
    %34 = vector.broadcast %33 : vector<8x1xf32> to vector<8x128xf32>
    %35 = arith.divf %31, %34 : vector<8x128xf32>
    %36 = vector.extract_strided_slice %35 {offsets = [0, 0], sizes = [8, 3], strides = [1, 1]} : vector<8x128xf32> to vector<8x3xf32>
    %c0_9 = arith.constant 0 : index
    %c0_10 = arith.constant 0 : index
    %37 = vector.load %arg3[%c0_9, %c0_10] : memref<8x3xf32, #tpu.memory_space<vmem>>, vector<8x3xf32>
    tpu.vector_store %arg3[%c0_9, %c0_10], %36 {strides = array<i32>} : memref<8x3xf32, #tpu.memory_space<vmem>>, vector<8x3xf32>,
    return
  }
  func.func @transform_0(%arg0: i32) -> (i32, i32) {
    %c0_i32 = arith.constant 0 : i32
    %c0_i32_0 = arith.constant 0 : i32
    return %arg0, %c0_i32 : i32, i32
  }
  func.func @transform_1(%arg0: i32) -> (i32, i32) {
    %c0_i32 = arith.constant 0 : i32
    %c0_i32_0 = arith.constant 0 : i32
    %c0_i32_1 = arith.constant 0 : i32
    return %c0_i32, %c0_i32_0 : i32, i32
  }
  func.func @transform_2(%arg0: i32) -> (i32, i32) {
    %c0_i32 = arith.constant 0 : i32
    %c0_i32_0 = arith.constant 0 : i32
    return %arg0, %c0_i32 : i32, i32
  }
}

</mosaic_0001>

<bundles_post_ra>
// kernel: actor_forward_packed.1
= control target key start
LH: loop header
LB: loop body
LE: loop exit
PB: predicated region body
PF: predicated region fallthrough
CT: control target
= control target key end

     0   :  { %7 = vsyncpa [#allocation3], 0  ;;  %s356_s12 = smov [#allocation2]   ;;  %s357_s14 = smov 64   ;;  %s385_s0 = inlined_call_operand.vmem [shape: f32[8,2], index: 0, kind: input, shape index: {}]   ;;  %s386_s1 = inlined_call_operand.hbm [shape: bf16[384,128], index: 1, kind: input, shape index: {}]   ;;  %s387_s2 = inlined_call_operand.vmem [shape: f32[8,3], index: 2, kind: output, shape index: {}]  }
   0x1   :  { %s14_s11 = sshll.u32 %s386_s1, 4  ;;  %s16_s13 = sshll.u32 %s356_s12, 4  ;;  %s15_s11 = int_to_ptr.hbm [resolvable:$true] %s14_s11  ;;  %s17_s13 = int_to_ptr.vmem [resolvable:$true] %s16_s13 }
   0x2   :  { %s358_s15 = smov 4  }
   0x3   :  { %22 = dma.hbm_to_vmem [thread:$0]  %s15_s11, 3072, %s17_s13, [#allocation3], %s357_s14, %s357_s14, %s358_s15  }
   0x4   :  { %354 = dma.done.wait [#allocation3], 3072  }
   0x5   :  { %355 = vsyncadd [#allocation3], 4294964224  ;;  %v359_v0 = vmov 0   ;;  %v27_v1 = vld [vmem:[%s385_s0] sm:$0xff]  ;;  %v306_v2 = vld [vmem:[#allocation2 + $0x78] sm:$0xff]  ;;  %v360_v5 = vmov 1   ;;  %v202_v34 = vlaneseq }
   0x6   :  { %320 = vset.pattern.permute.xlu0 %v359_v0  ;;  %110 = vmatpush.bf16.msra.mxu0 %v306_v2  ;;  %v305_v3 = vld [vmem:[#allocation2 + $0x70] sm:$0xff]  ;;  %v304_v4 = vld [vmem:[#allocation2 + $0x68] sm:$0xff]  ;;  %v303_v6 = vld [vmem:[#allocation2 + $0x60] sm:$0xff]  ;;  %vm228_vm5 = vcmask 23552  }
   0x7   :  { %32 = vperm.xlu0 %320, %v27_v1   ;;  %v302_v7 = vld [vmem:[#allocation2 + $0x58] sm:$0xff]  ;;  %v301_v8 = vld [vmem:[#allocation2 + $0x50] sm:$0xff]  ;;  %v300_v9 = vld [vmem:[#allocation2 + $0x48] sm:$0xff]  ;;  %v203_v35 = vand.u32 127, %v202_v34 }
   0x8   :  { %v299_v10 = vld [vmem:[#allocation2 + $0x40] sm:$0xff]  ;;  %v314_v11 = vld [vmem:[#allocation2 + $0xb8] sm:$0xff]  ;;  %v313_v12 = vld [vmem:[#allocation2 + $0xb0] sm:$0xff] }
   0x9   :  { %189 = vmatpush.bf16.msra.mxu1 %v314_v11  ;;  %v312_v13 = vld [vmem:[#allocation2 + $0xa8] sm:$0xff]  ;;  %v28_v14 = vld [vmem:[#allocation2] sm:$0xf]  ;;  %v310_v18 = vld [vmem:[#allocation2 + $0x98] sm:$0xff]  ;;  %vm204_vm0 = vcmp.lt.s32.totalorder %v203_v35, 3 }
   0xa   :  { %111 = vmatpush.bf16.msra.mxu0 %v305_v3  ;;  %v311_v16 = vld [vmem:[#allocation2 + $0xa0] sm:$0xff]  ;;  %v29_v17 = vunpack.c.l.bf16 %v28_v14  ;;  %v309_v22 = vld [vmem:[#allocation2 + $0x90] sm:$0xff]  ;;  %v308_v28 = vld [vmem:[#allocation2 + $0x88] sm:$0xff] }
   0xb   :  { %v307_v29 = vld [vmem:[#allocation2 + $0x80] sm:$0xff] }
   0xc   :  { %v35_v19 = vperm.slane %v29_v17, 0  ;;  %v41_v20 = vperm.slane %v29_v17, 1 }
   0xd   :  { %190 = vmatpush.bf16.msra.mxu1 %v313_v12 }
   0xe   :  { %112 = vmatpush.bf16.msra.mxu0 %v304_v4 }
   0xf   :  { %321 = vset.pattern.permute.xlu0 %v360_v5 }
  0x10   :  { %38 = vperm.xlu0 %321, %v27_v1  }
  0x11   :  { %191 = vmatpush.bf16.msra.mxu1 %v312_v13 }
  0x12   :  { %113 = vmatpush.bf16.msra.mxu0 %v303_v6 }
  0x15   :  { %192 = vmatpush.bf16.msra.mxu1 %v311_v16 }
  0x16   :  { %114 = vmatpush.bf16.msra.mxu0 %v302_v7 }
  0x19   :  { %193 = vmatpush.bf16.msra.mxu1 %v310_v18 }
  0x1a   :  { %115 = vmatpush.bf16.msra.mxu0 %v301_v8 }
  0x1d   :  { %194 = vmatpush.bf16.msra.mxu1 %v309_v22 }
  0x1e   :  { %116 = vmatpush.bf16.msra.mxu0 %v300_v9 }
  0x21   :  { %195 = vmatpush.bf16.msra.mxu1 %v308_v28 }
  0x22   :  { %117 = vmatpush.bf16.msra.mxu0 %v299_v10 }
  0x25   :  { %196 = vmatpush.bf16.msra.mxu1 %v307_v29 }
  0x79   :  { %v33_v15 = vpop.permute.xlu0 %32 }
  0x7a   :  { %v36_v23 = vmul.f32 %v35_v19, %v33_v15 }
  0x82   :  { %v39_v21 = vpop.permute.xlu0 %38 }
  0x83   :  { %v42_v24 = vmul.f32 %v41_v20, %v39_v21 }
  0x85   :  { %v43_v25 = vadd.f32 %v42_v24, %v36_v23 }
  0x87   :  { %322 = vtanh.f32 %v43_v25 }
  0x8d   :  { %v323_v26 = vpop.eup %322 }
  0x8e   :  { %v61_v27 = vpack.c.bf16 %v323_v26, %v323_v26 }
  0x90   :  { %118 = vmatmul.bf16.vlgmr.msra.gmra.mxu0 %v61_v27 }
 0x10d   :  { %v119_v30 = vpop.f32.mrf.mxu0 }
 0x10e   :  { %324 = vtanh.f32 %v119_v30 }
 0x114   :  { %v325_v31 = vpop.eup %324 }
 0x115   :  { %v121_v32 = vpop.f32.mrf.mxu0  ;;  %v140_v33 = vpack.c.bf16 %v325_v31, %v325_v31 }
 0x117   :  { %197 = vmatmul.bf16.vlgmr.msra.gmra.mxu1 %v140_v33 }
 0x194   :  { %v198_v36 = vpop.f32.mrf.mxu1 }
 0x195   :  { %v205_v37 = vsel %vm204_vm0, %v198_v36, -1e+30 }
 0x196   :  { %206 = vmax.xlane.f32.xlu1 %v205_v37 }
 0x19c   :  { %v200_v38 = vpop.f32.mrf.mxu1 }
 0x209   :  { %v207_v39 = vpop.xlane.xlu1 %206 }
 0x20a   :  { %v208_v40 = vsub.f32 %v205_v37, %v207_v39 }
 0x20c   :  { %v209_v41 = vmul.f32 1.442695, %v208_v40 }
 0x20e   :  { %326 = vpow2.f32 %v209_v41 }
 0x214   :  { %v327_v42 = vpop.eup %326 }
 0x215   :  { %211 = vadd.xlane.f32.xlu1 %v327_v42 }
 0x288   :  { %v212_v43 = vpop.xlane.xlu1 %211 }
 0x289   :  { %328 = vrcp.f32 %v212_v43  ;;  %v224_v47 = vand.u32 2147483648, %v212_v43  ;;  %v222_v49 = vand.u32 2147483647, %v212_v43  ;;  %vm218_vm2 = vweird.f32 %v212_v43 }
 0x28b   :  { %v225_v51 = vor.u32 1.1754944e-38, %v224_v47  ;;  %vm223_vm4 = vcmp.eq.f32.partialorder %v222_v49, 8.507059e+37 }
 0x28f   :  { %v329_v44 = vpop.eup %328 }
 0x290   :  { %v214_v45 = vmul.f32 %v329_v44, %v212_v43  ;;  %vm219_vm1 = vweird.f32 %v329_v44 }
 0x291   :  { %vm220_vm3 = vmor %vm218_vm2, %vm219_vm1 }
 0x292   :  { %v215_v46 = vsub.f32 1.0, %v214_v45 }
 0x294   :  { %v216_v48 = vmul.f32 %v329_v44, %v215_v46 }
 0x296   :  { %v217_v50 = vadd.f32 %v329_v44, %v216_v48 }
 0x298   :  { %v221_v52 = vsel %vm220_vm3, %v329_v44, %v217_v50 }
 0x299   :  { %v226_v53 = vsel %vm223_vm4, %v225_v51, %v221_v52 }
 0x29a   :  { %v227_v54 = vmul.f32 %v327_v42, %v226_v53 }
 0x29c   :  { %229 = vst.msk [vmem:[%s387_s2] sm:$0xff] %vm228_vm5, %v227_v54 }
 0x29d   :  { %234 = vsyncpa [#allocation3], 1 }

</bundles_post_ra>
